<compile_context>
chip_gen: v6e
topology: v6e:2x2x1
jax: 0.10.0
libtpu: 0.0.40
codegen_flags: <defaults>
</compile_context>

<pallas_src>
import numpy as np
import jax
import jax.numpy as jnp
from jax.experimental import pallas as pl
from jax.experimental.pallas import tpu as pltpu


def _round_up(x, m):
    return ((x + m - 1) // m) * m


# ---------------------------------------------------------------------------
# Pallas kernel: one grid step == B meshes (BV = B * V vertex rows).
# ---------------------------------------------------------------------------
def mesh_refine_kernel(samp_ref, pos_ref, adj_ref, wb_ref, w01_ref, wo_ref, out_ref):
    # Per-step views:
    #   samp_ref: (BV, C+1)    bf16  bilinear-sampled img feats | trailing 1 (bias lane)
    #   pos_ref : (BV, HN)     f32   pos xyz at lanes [hid:hid+3), 1.0 at lane hid+3
    #   adj_ref : (BV, BV)     bf16  block-diagonal packed adjacency tile (edge counts)
    #   wb_ref  : (C+1, HN)    bf16  bottleneck weight^T, bias folded into row C
    #   w01_ref : (L, HN, 2HN) bf16  fused [W0'|W1'] per layer (pos rows + bias row folded)
    #   wo_ref  : (HN, HN)     bf16  vert_offset weight^T mapped onto the vert lanes
    #   out_ref : (BV, HN)     f32   packed: nopos at [0:hid), refined verts at [hid:hid+3)
    L = w01_ref.shape[0]
    HN = w01_ref.shape[1]

    pos_slab = pos_ref[...]                                   # (BV, HN) f32
    adj = adj_ref[...]                                        # (BV, BV) bf16

    # ---- bottleneck Linear + ReLU (bias folded via samp's trailing 1-lane) ----
    nopos = jnp.maximum(
        jnp.dot(samp_ref[...], wb_ref[...],
                preferred_element_type=jnp.float32), 0.0)     # (BV, HN)
    feats = nopos + pos_slab                                  # re-insert pos / 1 lanes

    # ---- GraphConv stack: fused (h0|h1) matmul + adjacency matmul per layer ----
    # TODO(synk): for production mesh sizes tile the neighbor-sum over an
    # adjacency-column grid axis (f32 accumulator + pl.when init/finalize) or an
    # edge-list segment-sum; the dense (BV,BV) tile does not scale to V~4096.
    for l in range(L):
        h01 = jnp.dot(feats.astype(jnp.bfloat16), w01_ref[l],
                      preferred_element_type=jnp.float32)     # (BV, 2*HN)
        h0 = h01[:, :HN]
        h1 = h01[:, HN:]
        nsum = jnp.dot(adj, h1.astype(jnp.bfloat16),
                       preferred_element_type=jnp.float32)    # (BV, HN)
        nopos = jnp.maximum(h0 + nsum, 0.0)
        feats = nopos + pos_slab

    # ---- vert_offset Linear mapped onto the vert lanes, NaN cleanup, add to pos ----
    off = jnp.dot(feats.astype(jnp.bfloat16), wo_ref[...],
                  preferred_element_type=jnp.float32)         # non-zero only at vert lanes
    off = jnp.where(jnp.isnan(off), 0.0, off)
    # TODO(synk): vert_offset_threshold clamp skipped (module used with threshold=None).

    out_ref[...] = feats + off   # lanes [0:hid)=nopos, [hid:hid+3)=pos+offset (lane-dense store)


# ---------------------------------------------------------------------------
# Glue: projection, bilinear corner indices/weights, parameter setup.
# ---------------------------------------------------------------------------
def project_verts(verts, P, eps=0.1):
    """verts (N,V,3), P (N,4,4) -> (N,V,3). Mirrors the PyTorch reference."""
    N, V, _ = verts.shape
    ones = jnp.ones((N, V, 1), verts.dtype)
    verts_hom = jnp.concatenate([verts, ones], axis=2)          # (N,V,4)
    verts_cam = jnp.einsum('nvi,nji->nvj', verts_hom, P)        # bmm(v, P^T)
    w = verts_cam[:, :, 2:3]
    w_sign = jnp.where(w == 0, jnp.ones_like(w), jnp.sign(w))
    w = w_sign * jnp.maximum(jnp.abs(w), eps)
    return verts_cam[:, :, :3] / w


def bilinear_corner_indices(verts_ndc, H, W):
    """grid_sample semantics (align_corners=True, zeros padding):
    returns flat corner indices (N,V,4) int32 and weights (N,V,4) f32
    (weight 0 for out-of-bounds corners)."""
    x = verts_ndc[..., 0]
    y = verts_ndc[..., 1]
    ix = (x + 1.0) * 0.5 * (W - 1)
    iy = (y + 1.0) * 0.5 * (H - 1)
    ix0 = jnp.floor(ix)
    iy0 = jnp.floor(iy)
    ix1 = ix0 + 1.0
    iy1 = iy0 + 1.0
    wx1 = ix - ix0
    wx0 = 1.0 - wx1
    wy1 = iy - iy0
    wy0 = 1.0 - wy1
    corners = [(ix0, iy0, wx0 * wy0), (ix1, iy0, wx1 * wy0),
               (ix0, iy1, wx0 * wy1), (ix1, iy1, wx1 * wy1)]
    idxs, wgts = [], []
    for cx, cy, cw in corners:
        valid = ((cx >= 0) & (cx <= W - 1) & (cy >= 0) & (cy <= H - 1)).astype(jnp.float32)
        cxi = jnp.clip(cx, 0, W - 1).astype(jnp.int32)
        cyi = jnp.clip(cy, 0, H - 1).astype(jnp.int32)
        idxs.append(cyi * W + cxi)
        wgts.append(cw * valid)
    return jnp.stack(idxs, axis=-1), jnp.stack(wgts, axis=-1)


def bilinear_weight_matrix(verts_ndc, H, W):
    """Dense grid_sample weights (N,V,H*W) — used only by the pure-JAX reference."""
    idx, wgt = bilinear_corner_indices(verts_ndc, H, W)
    N, V, _ = idx.shape
    Wmat = jnp.zeros((N, V, H * W), jnp.float32)
    for j in range(4):
        Wmat = Wmat + jax.nn.one_hot(idx[..., j], H * W, dtype=jnp.float32) * wgt[..., j:j + 1]
    return Wmat


def init_params(key, img_feat_dim, hidden_dim, stage_depth):
    """Deterministic param init matching the module __init__ semantics."""
    ks = jax.random.split(key, 2 * stage_depth + 1)
    params = {}
    params['wb'] = 0.01 * jax.random.normal(ks[0], (hidden_dim, img_feat_dim), jnp.float32)
    params['bb'] = jnp.zeros((1, hidden_dim), jnp.float32)
    in_dim = hidden_dim + 3
    w0, w1 = [], []
    for i in range(stage_depth):
        w0.append(0.01 * jax.random.normal(ks[1 + 2 * i], (hidden_dim, in_dim), jnp.float32))
        w1.append(0.01 * jax.random.normal(ks[2 + 2 * i], (hidden_dim, in_dim), jnp.float32))
    params['w0'] = jnp.stack(w0)            # (L, hidden, hidden+3)
    params['w1'] = jnp.stack(w1)
    params['b0'] = jnp.zeros((stage_depth, 1, hidden_dim), jnp.float32)
    params['b1'] = jnp.zeros((stage_depth, 1, hidden_dim), jnp.float32)
    params['wo'] = jnp.zeros((3, hidden_dim + 3), jnp.float32)
    params['bo'] = jnp.zeros((1, 3), jnp.float32)
    return params


def mesh_geo_refinement_stage(img_feats, verts_padded, adj, params, P=None):
    """
    img_feats:    (N, C, H, W)   -- NCHW like PyTorch
    verts_padded: (N, V, 3)      -- equal-size meshes, so packed == reshape
    adj:          (VV, VV)       -- dense symmetric edge-count adjacency (packed,
                                    block-diagonal per mesh)
    Returns (verts_out_packed (VV,3), vert_feats_nopos (VV,hidden), None)
    """
    N, C, H, W = img_feats.shape
    V = verts_padded.shape[1]
    VV = N * V
    hidden = params['wb'].shape[0]
    L = params['w0'].shape[0]
    HN = _round_up(hidden + 4, 128)      # feature-slab lane width (nopos | pos | 1)
    CS = C + 1                           # samp | constant-1 column
    assert V % 16 == 0, "vertex count per mesh must be sublane aligned"

    # ---- vert_align: projection + 4-corner gather + bilinear combine (wrapper) ----
    vert_pos_padded = project_verts(verts_padded, P) if P is not None else verts_padded
    pos = verts_padded.reshape(VV, 3).astype(jnp.float32)

    imgf = jnp.transpose(img_feats.reshape(N, C, H * W), (0, 2, 1))          # (N, HW, C)
    idx, wgt = bilinear_corner_indices(vert_pos_padded, H, W)                # (N, V, 4)
    corners = jnp.take_along_axis(imgf, idx.reshape(N, V * 4)[..., None], axis=1)
    corners = corners.reshape(N, V, 4, C)
    samp = jnp.einsum('nvjc,nvj->nvc', corners, wgt).reshape(VV, C)
    samp_aug = jnp.concatenate(
        [samp, jnp.ones((VV, 1), samp.dtype)], axis=1).astype(jnp.bfloat16)  # (VV, CS)

    # ---- pos slab: xyz at lanes [hidden:hidden+3), 1.0 at lane hidden+3 ----
    pos_slab = jnp.zeros((VV, HN), jnp.float32)
    pos_slab = pos_slab.at[:, hidden:hidden + 3].set(pos)
    pos_slab = pos_slab.at[:, hidden + 3].set(1.0)

    # ---- batch B meshes per grid step so the MXU M dimension is filled ----
    B = min(N, -(-256 // V))             # aim for >= 256 vertex rows per step
    BV = B * V
    Np = -(-N // B) * B                  # pad mesh count to a multiple of B
    VVp = Np * V
    grid_n = Np // B
    if grid_n > 1:
        assert BV % 128 == 0, "multi-step grids need a lane-aligned (B*V) tile"

    if VVp > VV:
        samp_aug = jnp.pad(samp_aug, ((0, VVp - VV), (0, 0)))
        pos_slab = jnp.pad(pos_slab, ((0, VVp - VV), (0, 0)))
        adj = jnp.pad(adj, ((0, VVp - VV), (0, VVp - VV)))
    adj_bf = adj.astype(jnp.bfloat16)    # exact for integer edge counts < 256

    # ---- weight packing: bf16, pos rows + biases folded into the same matmuls ----
    wb_slab = jnp.zeros((CS, HN), jnp.float32)
    wb_slab = wb_slab.at[:C, :hidden].set(params['wb'].T)
    wb_slab = wb_slab.at[C, :hidden].set(params['bb'][0])
    wb_slab = wb_slab.astype(jnp.bfloat16)

    w01 = jnp.zeros((L, HN, 2 * HN), jnp.float32)
    w01 = w01.at[:, :hidden, :hidden].set(jnp.transpose(params['w0'][:, :, :hidden], (0, 2, 1)))
    w01 = w01.at[:, hidden:hidden + 3, :hidden].set(jnp.transpose(params['w0'][:, :, hidden:], (0, 2, 1)))
    w01 = w01.at[:, hidden + 3, :hidden].set(params['b0'][:, 0, :])
    w01 = w01.at[:, :hidden, HN:HN + hidden].set(jnp.transpose(params['w1'][:, :, :hidden], (0, 2, 1)))
    w01 = w01.at[:, hidden:hidden + 3, HN:HN + hidden].set(jnp.transpose(params['w1'][:, :, hidden:], (0, 2, 1)))
    w01 = w01.at[:, hidden + 3, HN:HN + hidden].set(params['b1'][:, 0, :])
    w01 = w01.astype(jnp.bfloat16)

    wo_slab = jnp.zeros((HN, HN), jnp.float32)
    wo_slab = wo_slab.at[:hidden, hidden:hidden + 3].set(params['wo'][:, :hidden].T)
    wo_slab = wo_slab.at[hidden:hidden + 3, hidden:hidden + 3].set(params['wo'][:, hidden:].T)
    wo_slab = wo_slab.at[hidden + 3, hidden:hidden + 3].set(params['bo'][0])
    wo_slab = wo_slab.astype(jnp.bfloat16)

    # ---- compiler hints: generation-aware VMEM cap + cost estimate ----
    def _nbytes(a):
        return int(a.size) * a.dtype.itemsize
    weight_bytes = _nbytes(wb_slab) + _nbytes(w01) + _nbytes(wo_slab)
    step_in_bytes = BV * (CS * 2 + HN * 4 + BV * 2)
    step_out_bytes = BV * HN * 4
    try:
        vmem_cap = int(pltpu.get_tpu_info().vmem_capacity_bytes)
    except Exception:
        vmem_cap = 128 * 1024 * 1024
    vmem_limit = int(min(max(4 * (weight_bytes + step_in_bytes + step_out_bytes),
                             32 * 1024 * 1024),
                         (3 * vmem_cap) // 4))
    step_flops = (2 * BV * CS * HN
                  + L * (2 * BV * HN * 2 * HN + 2 * BV * BV * HN)
                  + 2 * BV * HN * HN)
    cost = pl.CostEstimate(flops=int(grid_n * step_flops), transcendentals=0,
                           bytes_accessed=int(grid_n * (step_in_bytes + step_out_bytes)
                                              + weight_bytes))

    weight_mode = pl.Buffered(1)   # constant block index -> single-buffer the weights
    in_specs = [
        pl.BlockSpec((BV, CS), lambda i: (i, 0)),                               # sampled feats | 1
        pl.BlockSpec((BV, HN), lambda i: (i, 0)),                               # pos slab
        pl.BlockSpec((BV, BV), lambda i: (i, i)),                               # adjacency diag tile
        pl.BlockSpec((CS, HN), lambda i: (0, 0), pipeline_mode=weight_mode),    # bottleneck
        pl.BlockSpec((L, HN, 2 * HN), lambda i: (0, 0, 0), pipeline_mode=weight_mode),  # fused W0|W1
        pl.BlockSpec((HN, HN), lambda i: (0, 0), pipeline_mode=weight_mode),    # vert_offset
    ]
    out_specs = pl.BlockSpec((BV, HN), lambda i: (i, 0))

    out_slab = pl.pallas_call(
        mesh_refine_kernel,
        out_shape=jax.ShapeDtypeStruct((VVp, HN), jnp.float32),
        grid_spec=pltpu.PrefetchScalarGridSpec(
            num_scalar_prefetch=0,
            grid=(grid_n,),
            in_specs=in_specs,
            out_specs=out_specs),
        compiler_params=pltpu.CompilerParams(
            dimension_semantics=("parallel",),
            vmem_limit_bytes=vmem_limit),
        cost_estimate=cost,
    )(samp_aug, pos_slab, adj_bf, wb_slab, w01, wo_slab)

    verts_out = out_slab[:VV, hidden:hidden + 3]
    nopos = out_slab[:VV, :hidden]
    return verts_out, nopos, None


# ---------------------------------------------------------------------------
# Pure-JAX reference (dense one-hot bilinear path, f32) for correctness check.
# ---------------------------------------------------------------------------
def reference(img_feats, verts_padded, adj, params, P):
    N, C, H, W = img_feats.shape
    V = verts_padded.shape[1]
    VV = N * V
    vert_pos_padded = project_verts(verts_padded, P)
    pos = verts_padded.reshape(VV, 3)
    wbil = bilinear_weight_matrix(vert_pos_padded, H, W)
    imgf = jnp.transpose(img_feats.reshape(N, C, H * W), (0, 2, 1))
    samp = jnp.einsum('nvh,nhc->nvc', wbil, imgf).reshape(VV, C)
    va = jax.nn.relu(samp @ params['wb'].T + params['bb'])
    nopos = va
    L = params['w0'].shape[0]
    for l in range(L):
        feats = jnp.concatenate([nopos, pos], axis=1)
        h0 = feats @ params['w0'][l].T + params['b0'][l]
        h1 = feats @ params['w1'][l].T + params['b1'][l]
        nopos = jax.nn.relu(h0 + adj @ h1)
    feats = jnp.concatenate([nopos, pos], axis=1)
    off = feats @ params['wo'].T + params['bo']
    off = jnp.where(jnp.isnan(off), 0.0, off)
    return pos + off, nopos


# ---------------------------------------------------------------------------
def build_ring_adjacency(N, V):
    """Ring mesh edges per batch element; undirected dense adjacency (VV,VV)."""
    VV = N * V
    A = np.zeros((VV, VV), np.float32)
    for n in range(N):
        for i in range(V):
            a = n * V + i
            b = n * V + (i + 1) % V
            A[a, b] += 1.0
            A[b, a] += 1.0
    return jnp.asarray(A)


if __name__ == "__main__":
    key = jax.random.PRNGKey(0)
    k_img, k_vert, k_par = jax.random.split(key, 3)

    # Small shapes consistent with the module
    N, C, H, W = 2, 8, 16, 16          # img_feat_dim = 8
    V = 32                              # vertices per mesh
    hidden = 32
    stage_depth = 3

    img_feats = jax.random.normal(k_img, (N, C, H, W), jnp.float32)
    verts_padded = 0.3 * jax.random.normal(k_vert, (N, V, 3), jnp.float32)

    # Simple projection matrix: identity with a +z translation so w != 0
    P = jnp.tile(jnp.eye(4, dtype=jnp.float32)[None], (N, 1, 1))
    P = P.at[:, 2, 3].set(2.0)

    adj = build_ring_adjacency(N, V)
    params = init_params(k_par, C, hidden, stage_depth)

    verts_out, nopos, sem = mesh_geo_refinement_stage(img_feats, verts_padded, adj, params, P=P)
    jax.block_until_ready((verts_out, nopos))

    ref_verts, ref_nopos = reference(img_feats, verts_padded, adj, params, P)
    assert np.allclose(np.asarray(verts_out), np.asarray(ref_verts), rtol=2e-2, atol=3e-3), "verts mismatch"
    assert np.allclose(np.asarray(nopos), np.asarray(ref_nopos), rtol=2e-2, atol=3e-3), "nopos mismatch"

    print("KERNEL_OK")
</pallas_src>

<mosaic_0001>
module attributes {stable_mosaic.version = 11 : i64} {
  func.func @mesh_refine_kernel(%arg0: i32, %arg1: memref<64x9xbf16, #tpu.memory_space<vmem>>, %arg2: memref<64x128xf32, #tpu.memory_space<vmem>>, %arg3: memref<64x64xbf16, #tpu.memory_space<vmem>>, %arg4: memref<9x128xbf16, #tpu.memory_space<vmem>>, %arg5: memref<3x128x256xbf16, #tpu.memory_space<vmem>>, %arg6: memref<128x128xbf16, #tpu.memory_space<vmem>>, %arg7: memref<64x128xf32, #tpu.memory_space<vmem>>) attributes {dimension_semantics = [#tpu.dimension_semantics<parallel>], iteration_bounds = array<i64: 1>, scalar_prefetch = 0 : i64, scratch_operands = 0 : i64, tpu.core_type = #tpu.core_type<tc>, window_params = [{transform_indices = @transform_0, window_bounds = array<i64: 64, 9>}, {transform_indices = @transform_1, window_bounds = array<i64: 64, 128>}, {transform_indices = @transform_2, window_bounds = array<i64: 64, 64>}, {pipeline_mode = #tpu.pipeline_mode<synchronous>, transform_indices = @transform_3, window_bounds = array<i64: 9, 128>}, {pipeline_mode = #tpu.pipeline_mode<synchronous>, transform_indices = @transform_4, window_bounds = array<i64: 3, 128, 256>}, {pipeline_mode = #tpu.pipeline_mode<synchronous>, transform_indices = @transform_5, window_bounds = array<i64: 128, 128>}, {transform_indices = @transform_6, window_bounds = array<i64: 64, 128>}]} {
    %c0 = arith.constant 0 : index
    %c0_0 = arith.constant 0 : index
    %0 = vector.load %arg2[%c0, %c0_0] : memref<64x128xf32, #tpu.memory_space<vmem>>, vector<64x128xf32>
    %c0_1 = arith.constant 0 : index
    %c0_2 = arith.constant 0 : index
    %1 = vector.load %arg3[%c0_1, %c0_2] : memref<64x64xbf16, #tpu.memory_space<vmem>>, vector<64x64xbf16>
    %c0_3 = arith.constant 0 : index
    %c0_4 = arith.constant 0 : index
    %2 = vector.load %arg1[%c0_3, %c0_4] : memref<64x9xbf16, #tpu.memory_space<vmem>>, vector<64x9xbf16>
    %c0_5 = arith.constant 0 : index
    %c0_6 = arith.constant 0 : index
    %3 = vector.load %arg4[%c0_5, %c0_6] : memref<9x128xbf16, #tpu.memory_space<vmem>>, vector<9x128xbf16>
    %cst = arith.constant dense<0.000000e+00> : vector<64x128xf32>
    %4 = tpu.matmul %2, %3, %cst {dimension_numbers = #tpu.dot_dimension_numbers<[1], [0], [0], [1], [0, 0, 1, 1], [], []>} : vector<64x9xbf16>, vector<9x128xbf16>, vector<64x128xf32> -> vector<64x128xf32>
    %cst_7 = arith.constant 0.000000e+00 : f32
    %5 = vector.broadcast %cst_7 : f32 to vector<64x128xf32>
    %6 = arith.maximumf %4, %5 : vector<64x128xf32>
    %7 = arith.addf %6, %0 : vector<64x128xf32>
    %8 = arith.truncf %7 : vector<64x128xf32> to vector<64x128xbf16>
    %c0_8 = arith.constant 0 : index
    %c0_9 = arith.constant 0 : index
    %c0_10 = arith.constant 0 : index
    %9 = vector.load %arg5[%c0_8, %c0_9, %c0_10] : memref<3x128x256xbf16, #tpu.memory_space<vmem>>, vector<1x128x256xbf16>
    %10 = vector.shape_cast %9 : vector<1x128x256xbf16> to vector<128x256xbf16>
    %cst_11 = arith.constant dense<0.000000e+00> : vector<64x256xf32>
    %11 = tpu.matmul %8, %10, %cst_11 {dimension_numbers = #tpu.dot_dimension_numbers<[1], [0], [0], [1], [0, 0, 1, 1], [], []>} : vector<64x128xbf16>, vector<128x256xbf16>, vector<64x256xf32> -> vector<64x256xf32>
    %12 = vector.extract_strided_slice %11 {offsets = [0, 0], sizes = [64, 128], strides = [1, 1]} : vector<64x256xf32> to vector<64x128xf32>
    %13 = vector.extract_strided_slice %11 {offsets = [0, 128], sizes = [64, 128], strides = [1, 1]} : vector<64x256xf32> to vector<64x128xf32>
    %14 = arith.truncf %13 : vector<64x128xf32> to vector<64x128xbf16>
    %cst_12 = arith.constant dense<0.000000e+00> : vector<64x128xf32>
    %15 = tpu.matmul %1, %14, %cst_12 {dimension_numbers = #tpu.dot_dimension_numbers<[1], [0], [0], [1], [0, 0, 1, 1], [], []>} : vector<64x64xbf16>, vector<64x128xbf16>, vector<64x128xf32> -> vector<64x128xf32>
    %16 = arith.addf %12, %15 : vector<64x128xf32>
    %cst_13 = arith.constant 0.000000e+00 : f32
    %17 = vector.broadcast %cst_13 : f32 to vector<64x128xf32>
    %18 = arith.maximumf %16, %17 : vector<64x128xf32>
    %19 = arith.addf %18, %0 : vector<64x128xf32>
    %20 = arith.truncf %19 : vector<64x128xf32> to vector<64x128xbf16>
    %c1 = arith.constant 1 : index
    %c0_14 = arith.constant 0 : index
    %c0_15 = arith.constant 0 : index
    %21 = vector.load %arg5[%c1, %c0_14, %c0_15] : memref<3x128x256xbf16, #tpu.memory_space<vmem>>, vector<1x128x256xbf16>
    %22 = vector.shape_cast %21 : vector<1x128x256xbf16> to vector<128x256xbf16>
    %cst_16 = arith.constant dense<0.000000e+00> : vector<64x256xf32>
    %23 = tpu.matmul %20, %22, %cst_16 {dimension_numbers = #tpu.dot_dimension_numbers<[1], [0], [0], [1], [0, 0, 1, 1], [], []>} : vector<64x128xbf16>, vector<128x256xbf16>, vector<64x256xf32> -> vector<64x256xf32>
    %24 = vector.extract_strided_slice %23 {offsets = [0, 0], sizes = [64, 128], strides = [1, 1]} : vector<64x256xf32> to vector<64x128xf32>
    %25 = vector.extract_strided_slice %23 {offsets = [0, 128], sizes = [64, 128], strides = [1, 1]} : vector<64x256xf32> to vector<64x128xf32>
    %26 = arith.truncf %25 : vector<64x128xf32> to vector<64x128xbf16>
    %cst_17 = arith.constant dense<0.000000e+00> : vector<64x128xf32>
    %27 = tpu.matmul %1, %26, %cst_17 {dimension_numbers = #tpu.dot_dimension_numbers<[1], [0], [0], [1], [0, 0, 1, 1], [], []>} : vector<64x64xbf16>, vector<64x128xbf16>, vector<64x128xf32> -> vector<64x128xf32>
    %28 = arith.addf %24, %27 : vector<64x128xf32>
    %cst_18 = arith.constant 0.000000e+00 : f32
    %29 = vector.broadcast %cst_18 : f32 to vector<64x128xf32>
    %30 = arith.maximumf %28, %29 : vector<64x128xf32>
    %31 = arith.addf %30, %0 : vector<64x128xf32>
    %32 = arith.truncf %31 : vector<64x128xf32> to vector<64x128xbf16>
    %c2 = arith.constant 2 : index
    %c0_19 = arith.constant 0 : index
    %c0_20 = arith.constant 0 : index
    %33 = vector.load %arg5[%c2, %c0_19, %c0_20] : memref<3x128x256xbf16, #tpu.memory_space<vmem>>, vector<1x128x256xbf16>
    %34 = vector.shape_cast %33 : vector<1x128x256xbf16> to vector<128x256xbf16>
    %cst_21 = arith.constant dense<0.000000e+00> : vector<64x256xf32>
    %35 = tpu.matmul %32, %34, %cst_21 {dimension_numbers = #tpu.dot_dimension_numbers<[1], [0], [0], [1], [0, 0, 1, 1], [], []>} : vector<64x128xbf16>, vector<128x256xbf16>, vector<64x256xf32> -> vector<64x256xf32>
    %36 = vector.extract_strided_slice %35 {offsets = [0, 0], sizes = [64, 128], strides = [1, 1]} : vector<64x256xf32> to vector<64x128xf32>
    %37 = vector.extract_strided_slice %35 {offsets = [0, 128], sizes = [64, 128], strides = [1, 1]} : vector<64x256xf32> to vector<64x128xf32>
    %38 = arith.truncf %37 : vector<64x128xf32> to vector<64x128xbf16>
    %cst_22 = arith.constant dense<0.000000e+00> : vector<64x128xf32>
    %39 = tpu.matmul %1, %38, %cst_22 {dimension_numbers = #tpu.dot_dimension_numbers<[1], [0], [0], [1], [0, 0, 1, 1], [], []>} : vector<64x64xbf16>, vector<64x128xbf16>, vector<64x128xf32> -> vector<64x128xf32>
    %40 = arith.addf %36, %39 : vector<64x128xf32>
    %cst_23 = arith.constant 0.000000e+00 : f32
    %41 = vector.broadcast %cst_23 : f32 to vector<64x128xf32>
    %42 = arith.maximumf %40, %41 : vector<64x128xf32>
    %43 = arith.addf %42, %0 : vector<64x128xf32>
    %44 = arith.truncf %43 : vector<64x128xf32> to vector<64x128xbf16>
    %c0_24 = arith.constant 0 : index
    %c0_25 = arith.constant 0 : index
    %45 = vector.load %arg6[%c0_24, %c0_25] : memref<128x128xbf16, #tpu.memory_space<vmem>>, vector<128x128xbf16>
    %cst_26 = arith.constant dense<0.000000e+00> : vector<64x128xf32>
    %46 = tpu.matmul %44, %45, %cst_26 {dimension_numbers = #tpu.dot_dimension_numbers<[1], [0], [0], [1], [0, 0, 1, 1], [], []>} : vector<64x128xbf16>, vector<128x128xbf16>, vector<64x128xf32> -> vector<64x128xf32>
    %47 = arith.cmpf one, %46, %46 : vector<64x128xf32>
    %cst_27 = arith.constant 0.000000e+00 : f32
    %48 = vector.broadcast %cst_27 : f32 to vector<64x128xf32>
    %49 = arith.select %47, %48, %46 : vector<64x128xi1>, vector<64x128xf32>
    %50 = arith.addf %43, %49 : vector<64x128xf32>
    %c0_28 = arith.constant 0 : index
    %c0_29 = arith.constant 0 : index
    %51 = vector.load %arg7[%c0_28, %c0_29] : memref<64x128xf32, #tpu.memory_space<vmem>>, vector<64x128xf32>
    tpu.vector_store %arg7[%c0_28, %c0_29], %50 {strides = array<i32>} : memref<64x128xf32, #tpu.memory_space<vmem>>, vector<64x128xf32>,
    return
  }
  func.func @transform_0(%arg0: i32) -> (i32, i32) {
    %c0_i32 = arith.constant 0 : i32
    %c0_i32_0 = arith.constant 0 : i32
    return %arg0, %c0_i32 : i32, i32
  }
  func.func @transform_1(%arg0: i32) -> (i32, i32) {
    %c0_i32 = arith.constant 0 : i32
    %c0_i32_0 = arith.constant 0 : i32
    return %arg0, %c0_i32 : i32, i32
  }
  func.func @transform_2(%arg0: i32) -> (i32, i32) {
    %c0_i32 = arith.constant 0 : i32
    return %arg0, %arg0 : i32, i32
  }
  func.func @transform_3(%arg0: i32) -> (i32, i32) {
    %c0_i32 = arith.constant 0 : i32
    %c0_i32_0 = arith.constant 0 : i32
    %c0_i32_1 = arith.constant 0 : i32
    return %c0_i32, %c0_i32_0 : i32, i32
  }
  func.func @transform_4(%arg0: i32) -> (i32, i32, i32) {
    %c0_i32 = arith.constant 0 : i32
    %c0_i32_0 = arith.constant 0 : i32
    %c0_i32_1 = arith.constant 0 : i32
    %c0_i32_2 = arith.constant 0 : i32
    return %c0_i32, %c0_i32_0, %c0_i32_1 : i32, i32, i32
  }
  func.func @transform_5(%arg0: i32) -> (i32, i32) {
    %c0_i32 = arith.constant 0 : i32
    %c0_i32_0 = arith.constant 0 : i32
    %c0_i32_1 = arith.constant 0 : i32
    return %c0_i32, %c0_i32_0 : i32, i32
  }
  func.func @transform_6(%arg0: i32) -> (i32, i32) {
    %c0_i32 = arith.constant 0 : i32
    %c0_i32_0 = arith.constant 0 : i32
    return %arg0, %c0_i32 : i32, i32
  }
}

</mosaic_0001>

<bundles_post_ra>
// kernel: tpu_custom_call.1
= control target key start
LH: loop header
LB: loop body
LE: loop exit
PB: predicated region body
PF: predicated region fallthrough
CT: control target
= control target key end

     0   :  { %11 = vsyncpa [#allocation3], 0  ;;  %s1870_s0 = inlined_call_operand.vmem [shape: bf16[64,9], index: 0, kind: input, shape index: {}]   ;;  %s1871_s1 = inlined_call_operand.hbm [shape: f32[64,128], index: 1, kind: input, shape index: {}]   ;;  %s1872_s2 = inlined_call_operand.vmem [shape: bf16[64,64], index: 2, kind: input, shape index: {}]   ;;  %s1873_s3 = inlined_call_operand.vmem [shape: bf16[9,128], index: 3, kind: input, shape index: {}]   ;;  %s1874_s4 = inlined_call_operand.hbm [shape: bf16[3,128,256], index: 4, kind: input, shape index: {}]   ;;  %s1875_s5 = inlined_call_operand.hbm [shape: bf16[128,128], index: 5, kind: input, shape index: {}]   ;;  %s1876_s6 = inlined_call_operand.hbm [shape: f32[64,128], index: 6, kind: output, shape index: {}]  }
   0x1   :  { %12 = vsyncpa [#allocation6], 0 }
   0x2   :  { %13 = vsyncpa [#allocation4], 0  ;;  %s1639_s21 = smov [#allocation5]   ;;  %s1640_s23 = smov [#allocation2]  }
   0x3   :  { %s37_s22 = sshll.u32 %s1639_s21, 4  ;;  %s21_s24 = sshll.u32 %s1640_s23, 4  ;;  %s38_s22 = int_to_ptr.vmem [resolvable:$true] %s37_s22  ;;  %s22_s24 = int_to_ptr.vmem [resolvable:$true] %s21_s24 }
   0x4   :  { %s1561_s25 = scalar_lea.vmem %s38_s22, 6144  ;;  %p1566_p1 = scmp.lt.s32.totalorder %s38_s22, %s38_s22 }
   0x5   :  { %p1562_p0 = scmp.ne.s32.totalorder %s38_s22, %s1561_s25  ;;  %p1567_p2 = scmp.lt.s32.totalorder %s1561_s25, %s1561_s25 }
   0x7   :  { %p1568_p3 = por %p1567_p2, %p1566_p1 }
   0x9   :  { %p1569_p4 = pnand %p1568_p3, %p1562_p0 }
   0xb   :  { %1572 = shalt.err (!%p1569_p4)
}
   0xc   :  { %s1641_s26 = smov 128   ;;  %s1642_s27 = smov 8  }
   0xd   :  { %43 = dma.hbm_to_vmem [thread:$0]  %s1874_s4, 6144, %s38_s22, [#allocation6], %s1641_s26, %s1641_s26, %s1642_s27  }
   0xe   :  { %s1581_s30 = scalar_lea.vmem %s22_s24, 1024  ;;  %p1586_p6 = scmp.lt.s32.totalorder %s22_s24, %s22_s24 }
   0xf   :  { %p1582_p5 = scmp.ne.s32.totalorder %s22_s24, %s1581_s30  ;;  %p1587_p7 = scmp.lt.s32.totalorder %s1581_s30, %s1581_s30 }
  0x11   :  { %p1588_p8 = por %p1587_p7, %p1586_p6 }
  0x13   :  { %p1589_p9 = pnand %p1588_p8, %p1582_p5 }
  0x15   :  { %1592 = shalt.err (!%p1589_p9)
}
  0x16   :  { %27 = dma.hbm_to_vmem [thread:$0]  %s1871_s1, 1024, %s22_s24, [#allocation3], %s1641_s26, %s1641_s26, %s1642_s27  }
  0x17   :  { %s1643_s9 = smov [#allocation7]  }
  0x18   :  { %s49_s10 = sshll.u32 %s1643_s9, 4  ;;  %s50_s10 = int_to_ptr.vmem [resolvable:$true] %s49_s10 }
  0x19   :  { %s1601_s11 = scalar_lea.vmem %s50_s10, 1024  ;;  %p1606_p11 = scmp.lt.s32.totalorder %s50_s10, %s50_s10 }
  0x1a   :  { %p1602_p10 = scmp.ne.s32.totalorder %s50_s10, %s1601_s11  ;;  %p1607_p12 = scmp.lt.s32.totalorder %s1601_s11, %s1601_s11 }
  0x1c   :  { %p1608_p13 = por %p1607_p12, %p1606_p11 }
  0x1e   :  { %p1609_p0 = pnand %p1608_p13, %p1602_p10 }
  0x20   :  { %1612 = shalt.err (!%p1609_p0)
}
  0x21   :  { %s1644_s4 = smov 64   ;;  %s1645_s12 = smov 4  }
  0x22   :  { %55 = dma.hbm_to_vmem [thread:$0]  %s1875_s5, 1024, %s50_s10, [#allocation6], %s1644_s4, %s1644_s4, %s1645_s12  }
  0x23   :  { %1633 = dma.done.wait [#allocation3], 1024  }
  0x24   :  { %1634 = vsyncadd [#allocation3], 4294966272 }
  0x25   :  { %1635 = dma.done.wait [#allocation6], 7168  }
  0x26   :  { %1636 = vsyncadd [#allocation6], 4294960128  ;;  %vm130_vm0 = vcmask 1043456   ;;  %vm131_vm1 = vcmask 1044480   ;;  %v1646_v0 = vmov 65535   ;;  %vm117_vm2 = vcmask 72704  }
  0x27   :  { %v132_v1 = vsel %vm130_vm0, 4294967295, %v1646_v0  ;;  %v1464_v3 = vld [vmem:[%s1873_s3] sm:$0x1f]   ;;  %v1466_v6 = vld [vmem:[%s1870_s0 + $0x8] sm:$0xff]   ;;  %v1467_v7 = vld [vmem:[%s1870_s0 + $0x10] sm:$0xff]   ;;  %v1647_v25 = vmov 0  }
  0x28   :  { %v133_v2 = vsel %vm131_vm1, %v132_v1, 0  ;;  %v1465_v4 = vld [vmem:[%s1870_s0] sm:$0xff]   ;;  %v1469_v8 = vld [vmem:[#allocation5 + $0x74] ss:$8 sps:$4 sm:$0xff]   ;;  %v1471_v9 = vld [vmem:[#allocation5 + $0x70] ss:$8 sps:$4 sm:$0xff]   ;;  %350 = vmatprep.mubr.bf16.mxu1 %v1647_v25 }
  0x29   :  { %v135_v5 = vand.u32 %v1464_v3, %v133_v2  ;;  %1358 = vmatprep.mubr.msk.bf16.mxu0 %vm117_vm2, %v1465_v4  ;;  %318 = vmatprep.subr.bf16.mxu1 %v1469_v8  ;;  %v1472_v10 = vld [vmem:[#allocation5 + $0x64] ss:$8 sps:$4 sm:$0xff]   ;;  %v1474_v11 = vld [vmem:[#allocation5 + $0x60] ss:$8 sps:$4 sm:$0xff]   ;;  %v1475_v12 = vld [vmem:[#allocation5 + $0x54] ss:$8 sps:$4 sm:$0xff]  }
  0x2a   :  { %319 = vmatpush1.bf16.msra.mxu1 %v1471_v9  ;;  %v1468_v13 = vld [vmem:[%s1870_s0 + $0x18] sm:$0xff]   ;;  %v1478_v15 = vld [vmem:[#allocation5 + $0x44] ss:$8 sps:$4 sm:$0xff]   ;;  %v1480_v16 = vld [vmem:[#allocation5 + $0x40] ss:$8 sps:$4 sm:$0xff]   ;;  %vm415_vm3 = vcmask 523264  }
  0x2b   :  { %1356 = vmatprep.subr.bf16.mxu0 %v135_v5  ;;  %320 = vmatprep.subr.bf16.mxu1 %v1472_v10  ;;  %v1477_v14 = vld [vmem:[#allocation5 + $0x50] ss:$8 sps:$4 sm:$0xff]   ;;  %v1481_v17 = vld [vmem:[#allocation5 + $0x34] ss:$8 sps:$4 sm:$0xff]   ;;  %v1484_v19 = vld [vmem:[#allocation5 + $0x24] ss:$8 sps:$4 sm:$0xff]  }
  0x2c   :  { %1357 = vmatpush3.bf16.msra.mxu0 %v135_v5  ;;  %v1483_v18 = vld [vmem:[#allocation5 + $0x30] ss:$8 sps:$4 sm:$0xff]   ;;  %v1486_v20 = vld [vmem:[#allocation5 + $0x20] ss:$8 sps:$4 sm:$0xff]   ;;  %v1487_v21 = vld [vmem:[#allocation5 + $0x14] ss:$8 sps:$4 sm:$0xff]  }
  0x2d   :  { %v1489_v22 = vld [vmem:[#allocation5 + $0x10] ss:$8 sps:$4 sm:$0xff]   ;;  %v1490_v23 = vld [vmem:[#allocation5 + $0x4] ss:$8 sps:$4 sm:$0xff]   ;;  %v1492_v24 = vld [vmem:[#allocation5] ss:$8 sps:$4 sm:$0xff]  }
  0x2e   :  { %321 = vmatpush1.bf16.msra.mxu1 %v1474_v11  ;;  %v1719_v30 = vld [vmem:[#allocation2] sm:$0xff]  ;;  %v1721_v31 = vld [vmem:[#allocation2 + $0x8] sm:$0xff]  ;;  %v1725_v40 = vld [vmem:[#allocation2 + $0x18] sm:$0xff] }
  0x2f   :  { %1359 = vmatmul.mubr.msk.bf16.vlgmr.msra.gmra.mxu0 %vm117_vm2, %v1466_v6  ;;  %322 = vmatprep.subr.bf16.mxu1 %v1475_v12  ;;  %v1727_v43 = vld [vmem:[#allocation2 + $0x10] sm:$0xff]  ;;  %v1732_v50 = vld [vmem:[#allocation2 + $0x20] sm:$0xff]  ;;  %v1734_v51 = vld [vmem:[#allocation2 + $0x28] sm:$0xff] }
  0x30   :  { %1362 = vmatprep.mubr.msk.bf16.mxu0 %vm117_vm2, %v1467_v7  ;;  %v1739_v57 = vld [vmem:[#allocation2 + $0x30] sm:$0xff]  ;;  %v1741_v58 = vld [vmem:[#allocation2 + $0x38] sm:$0xff]  ;;  %v1749_v62 = vld [vmem:[%s1872_s2] sm:$0xff]  }
  0x32   :  { %323 = vmatpush1.bf16.msra.mxu1 %v1477_v14 }
  0x33   :  { %324 = vmatprep.subr.bf16.mxu1 %v1478_v15 }
  0x36   :  { %325 = vmatpush1.bf16.msra.mxu1 %v1480_v16 }
  0x37   :  { %1363 = vmatmul.mubr.msk.bf16.gmra.mxu0 %vm117_vm2, %v1468_v13  ;;  %326 = vmatprep.subr.bf16.mxu1 %v1481_v17 }
  0x38   :  { %1374 = vmatprep.mubr.msk.bf16.mxu0 %vm415_vm3, %v1749_v62 }
  0x3a   :  { %327 = vmatpush1.bf16.msra.mxu1 %v1483_v18 }
  0x3b   :  { %328 = vmatprep.subr.bf16.mxu1 %v1484_v19  ;;  %v1499_v19 = vld [vmem:[#allocation5 + $0xf4] ss:$8 sps:$4 sm:$0xff]  }
  0x3e   :  { %329 = vmatpush1.bf16.msra.mxu1 %v1486_v20  ;;  %v1774_v20 = vld [vmem:[%s1872_s2 + $0x8] sm:$0xff]  }
  0x3f   :  { %330 = vmatprep.subr.bf16.mxu1 %v1487_v21  ;;  %v1779_v21 = vld [vmem:[%s1872_s2 + $0x10] sm:$0xff]  }
  0x42   :  { %331 = vmatpush1.bf16.msra.mxu1 %v1489_v22  ;;  %v1497_v22 = vld [vmem:[#allocation5 + $0xf0] ss:$8 sps:$4 sm:$0xff]  }
  0x43   :  { %332 = vmatprep.subr.bf16.mxu1 %v1490_v23  ;;  %v1502_v23 = vld [vmem:[#allocation5 + $0xe4] ss:$8 sps:$4 sm:$0xff]  }
  0x46   :  { %333 = vmatpush1.bf16.msra.mxu1 %v1492_v24  ;;  %v1500_v24 = vld [vmem:[#allocation5 + $0xe0] ss:$8 sps:$4 sm:$0xff]  }
  0xef   :  { %v1360_v26 = vpop.f32.mrf.mxu0 }
  0xf0   :  { %v204_v42 = vmax.f32 %v1360_v26, 0.0  ;;  %v1505_v26 = vld [vmem:[#allocation5 + $0xd4] ss:$8 sps:$4 sm:$0xff]  }
  0xf1   :  { %v171_v27 = vpop.f32.mrf.mxu0 }
  0xf2   :  { %v202_v29 = vmax.f32 %v171_v27, 0.0  ;;  %v212_v46 = vadd.f32 %v204_v42, %v1727_v43  ;;  %v1788_v27 = vld [vmem:[%s1872_s2 + $0x18] sm:$0xff]   ;;  %s1648_s2 = smov [#allocation8]  }
  0xf3   :  { %v1361_v28 = vpop.f32.mrf.mxu0  ;;  %s1221_s7 = sshll.u32 %s1648_s2, 4  ;;  %s1222_s7 = int_to_ptr.vmem [resolvable:$true] %s1221_s7 }
  0xf4   :  { %v210_v35 = vadd.f32 %v202_v29, %v1719_v30  ;;  %v205_v38 = vmax.f32 %v1361_v28, 0.0  ;;  %v1503_v28 = vld [vmem:[#allocation5 + $0xd0] ss:$8 sps:$4 sm:$0xff]   ;;  %v1508_v29 = vld [vmem:[#allocation5 + $0xc4] ss:$8 sps:$4 sm:$0xff]   ;;  %s1613_s8 = scalar_lea.vmem %s1222_s7, 1024  ;;  %p1618_p2 = scmp.lt.s32.totalorder %s1222_s7, %s1222_s7 }
  0xf5   :  { %v174_v32 = vpop.f32.mrf.mxu0  ;;  %p1614_p1 = scmp.ne.s32.totalorder %s1222_s7, %s1613_s8  ;;  %p1619_p3 = scmp.lt.s32.totalorder %s1613_s8, %s1613_s8 }
  0xf6   :  { %v203_v33 = vmax.f32 %v174_v32, 0.0  ;;  %v213_v44 = vadd.f32 %v205_v38, %v1725_v40  ;;  %v1506_v32 = vld [vmem:[#allocation5 + $0xc0] ss:$8 sps:$4 sm:$0xff]   ;;  %v1515_v38 = vld [vmem:[#allocation5 + $0x90] ss:$8 sps:$4 sm:$0xff]  }
  0xf7   :  { %v1364_v34 = vpop.f32.mrf.mxu0  ;;  %p1620_p4 = por %p1619_p3, %p1618_p2 }
  0xf8   :  { %v211_v36 = vadd.f32 %v203_v33, %v1721_v31  ;;  %v219_v49 = vpack.c.bf16 %v213_v44, %v212_v46  ;;  %v208_v54 = vmax.f32 %v1364_v34, 0.0  ;;  %v1511_v33 = vld [vmem:[#allocation5 + $0xb4] ss:$8 sps:$4 sm:$0xff]   ;;  %v1509_v34 = vld [vmem:[#allocation5 + $0xb0] ss:$8 sps:$4 sm:$0xff]  }
  0xf9   :  { %v187_v37 = vpop.f32.mrf.mxu0  ;;  %p1621_p5 = pnand %p1620_p4, %p1614_p1 }
  0xfa   :  { %v218_v39 = vpack.c.bf16 %v211_v36, %v210_v35  ;;  %v206_v47 = vmax.f32 %v187_v37, 0.0  ;;  %v216_v59 = vadd.f32 %v208_v54, %v1739_v57  ;;  %v1514_v35 = vld [vmem:[#allocation5 + $0xa4] ss:$8 sps:$4 sm:$0xff]   ;;  %v1512_v36 = vld [vmem:[#allocation5 + $0xa0] ss:$8 sps:$4 sm:$0xff]  }
  0xfb   :  { %v1365_v41 = vpop.f32.mrf.mxu0  ;;  %v1517_v37 = vld [vmem:[#allocation5 + $0x94] ss:$8 sps:$4 sm:$0xff]  }
  0xfc   :  { %351 = vmatmul.mubr.bf16.vlgmr.msra.gmra.mxu1 %v218_v39  ;;  %v214_v52 = vadd.f32 %v206_v47, %v1732_v50  ;;  %v209_v55 = vmax.f32 %v1365_v41, 0.0  ;;  %v1520_v39 = vld [vmem:[#allocation5 + $0x84] ss:$8 sps:$4 sm:$0xff]   ;;  %v1518_v41 = vld [vmem:[#allocation5 + $0x80] ss:$8 sps:$4 sm:$0xff]  }
  0xfd   :  { %360 = vmatprep.mubr.bf16.mxu1 %v1647_v25  ;;  %v190_v45 = vpop.f32.mrf.mxu0 }
  0xfe   :  { %v207_v48 = vmax.f32 %v190_v45, 0.0  ;;  %v217_v60 = vadd.f32 %v209_v55, %v1741_v58 }
 0x100   :  { %v215_v53 = vadd.f32 %v207_v48, %v1734_v51  ;;  %v221_v61 = vpack.c.bf16 %v217_v60, %v216_v59 }
 0x102   :  { %v220_v56 = vpack.c.bf16 %v215_v53, %v214_v52 }
 0x104   :  { %361 = vmatmul.mubr.bf16.gmra.mxu1 %v219_v49 }
 0x105   :  { %370 = vmatprep.mubr.bf16.mxu1 %v1647_v25 }
 0x10c   :  { %371 = vmatmul.mubr.bf16.gmra.mxu1 %v220_v56 }
 0x10d   :  { %380 = vmatprep.mubr.bf16.mxu1 %v1647_v25 }
 0x114   :  { %381 = vmatmul.mubr.bf16.gmra.mxu1 %v221_v61 }
 0x115   :  { %1390 = vmatprep.mubr.msk.bf16.mxu1 %vm415_vm3, %v1749_v62 }
 0x1bc   :  { %v1755_v63 = vpop.f32.mrf.mxu1 }
 0x1be   :  { %v354_v0 = vpop.f32.mrf.mxu1 }
 0x1c0   :  { %v1757_v1 = vpop.f32.mrf.mxu1 }
 0x1c2   :  { %v358_v2 = vpop.f32.mrf.mxu1 }
 0x1c3   :  { %v391_v18 = vpack.c.bf16 %v358_v2, %v354_v0 }
 0x1c4   :  { %v1759_v3 = vpop.f32.mrf.mxu1 }
 0x1c6   :  { %v364_v4 = vpop.f32.mrf.mxu1 }
 0x1c8   :  { %v1761_v5 = vpop.f32.mrf.mxu1 }
 0x1ca   :  { %v368_v6 = vpop.f32.mrf.mxu1 }
 0x1cb   :  { %v392_v17 = vpack.c.bf16 %v368_v6, %v364_v4 }
 0x1cc   :  { %v1763_v7 = vpop.f32.mrf.mxu1 }
 0x1ce   :  { %v374_v8 = vpop.f32.mrf.mxu1 }
 0x1d0   :  { %v1765_v9 = vpop.f32.mrf.mxu1 }
 0x1d2   :  { %v378_v10 = vpop.f32.mrf.mxu1 }
 0x1d3   :  { %v393_v16 = vpack.c.bf16 %v378_v10, %v374_v8 }
 0x1d4   :  { %v1767_v11 = vpop.f32.mrf.mxu1 }
 0x1d6   :  { %v384_v12 = vpop.f32.mrf.mxu1 }
 0x1d8   :  { %v1769_v13 = vpop.f32.mrf.mxu1 }
 0x1da   :  { %v388_v14 = vpop.f32.mrf.mxu1 }
 0x1db   :  { %v394_v15 = vpack.c.bf16 %v388_v14, %v384_v12 }
 0x1dd   :  { %1366 = vmatprep.subr.bf16.mxu0 %v394_v15 }
 0x1de   :  { %1367 = vmatpush3.bf16.msra.mxu0 %v394_v15 }
 0x1df   :  { %1368 = vmatprep.subr.bf16.mxu0 %v393_v16 }
 0x1e2   :  { %1369 = vmatpush3.bf16.msra.mxu0 %v393_v16 }
 0x1e3   :  { %1370 = vmatprep.subr.bf16.mxu0 %v392_v17 }
 0x1e6   :  { %1371 = vmatpush3.bf16.msra.mxu0 %v392_v17 }
 0x1e7   :  { %1372 = vmatprep.subr.bf16.mxu0 %v391_v18 }
 0x1ea   :  { %1373 = vmatpush3.bf16.msra.mxu0 %v391_v18 }
 0x1eb   :  { %618 = vmatprep.subr.bf16.mxu0 %v1499_v19 }
 0x1ed   :  { %1375 = vmatmul.mubr.msk.bf16.vlgmr.msra.gmra.mxu0 %vm415_vm3, %v1774_v20 }
 0x1ee   :  { %1378 = vmatprep.mubr.msk.bf16.mxu0 %vm415_vm3, %v1779_v21  ;;  %619 = vmatpush1.bf16.msra.mxu0 %v1497_v22 }
 0x1ef   :  { %620 = vmatprep.subr.bf16.mxu0 %v1502_v23 }
 0x1f2   :  { %621 = vmatpush1.bf16.msra.mxu0 %v1500_v24  ;;  %v1523_v24 = vld [vmem:[#allocation5 + $0x174] ss:$8 sps:$4 sm:$0xff]  }
 0x1f3   :  { %622 = vmatprep.subr.bf16.mxu0 %v1505_v26  ;;  %v1526_v26 = vld [vmem:[#allocation5 + $0x164] ss:$8 sps:$4 sm:$0xff]  }
 0x1f5   :  { %1379 = vmatmul.mubr.msk.bf16.gmra.mxu0 %vm415_vm3, %v1788_v27 }
 0x1f6   :  { %623 = vmatpush1.bf16.msra.mxu0 %v1503_v28  ;;  %650 = vmatprep.mubr.bf16.mxu0 %v1647_v25  ;;  %v1529_v28 = vld [vmem:[#allocation5 + $0x154] ss:$8 sps:$4 sm:$0xff]  }
 0x1f7   :  { %624 = vmatprep.subr.bf16.mxu0 %v1508_v29  ;;  %v1527_v29 = vld [vmem:[#allocation5 + $0x150] ss:$8 sps:$4 sm:$0xff]  }
 0x1fa   :  { %625 = vmatpush1.bf16.msra.mxu0 %v1506_v32  ;;  %v1532_v32 = vld [vmem:[#allocation5 + $0x144] ss:$8 sps:$4 sm:$0xff]  }
 0x1fb   :  { %626 = vmatprep.subr.bf16.mxu0 %v1511_v33  ;;  %v1530_v33 = vld [vmem:[#allocation5 + $0x140] ss:$8 sps:$4 sm:$0xff]  }
 0x1fe   :  { %627 = vmatpush1.bf16.msra.mxu0 %v1509_v34  ;;  %v1535_v34 = vld [vmem:[#allocation5 + $0x134] ss:$8 sps:$4 sm:$0xff]  }
 0x1ff   :  { %628 = vmatprep.subr.bf16.mxu0 %v1514_v35  ;;  %v1533_v35 = vld [vmem:[#allocation5 + $0x130] ss:$8 sps:$4 sm:$0xff]  }
 0x202   :  { %629 = vmatpush1.bf16.msra.mxu0 %v1512_v36 }
 0x203   :  { %630 = vmatprep.subr.bf16.mxu0 %v1517_v37 }
 0x206   :  { %631 = vmatpush1.bf16.msra.mxu0 %v1515_v38 }
 0x207   :  { %632 = vmatprep.subr.bf16.mxu0 %v1520_v39 }
 0x20a   :  { %633 = vmatpush1.bf16.msra.mxu0 %v1518_v41 }
 0x20b   :  { %885 = vmatprep.subr.bf16.mxu0 %v1523_v24 }
 0x2ad   :  { %v1376_v42 = vpop.f32.mrf.mxu0 }
 0x2ae   :  { %v495_v56 = vadd.f32 %v1376_v42, %v1759_v3 }
 0x2af   :  { %v462_v44 = vpop.f32.mrf.mxu0 }
 0x2b0   :  { %v493_v45 = vadd.f32 %v462_v44, %v1755_v63  ;;  %v503_v4 = vmax.f32 %v495_v56, 0.0 }
 0x2b1   :  { %v1377_v46 = vpop.f32.mrf.mxu0 }
 0x2b2   :  { %v501_v48 = vmax.f32 %v493_v45, 0.0  ;;  %v496_v53 = vadd.f32 %v1377_v46, %v1761_v5  ;;  %v511_v6 = vadd.f32 %v503_v4, %v1727_v43  ;;  %v1539_v4 = vld [vmem:[#allocation5 + $0x110] ss:$8 sps:$4 sm:$0xff]  }
 0x2b3   :  { %v465_v47 = vpop.f32.mrf.mxu0 }
 0x2b4   :  { %v494_v49 = vadd.f32 %v465_v47, %v1757_v1  ;;  %v509_v59 = vadd.f32 %v501_v48, %v1719_v30  ;;  %v504_v0 = vmax.f32 %v496_v53, 0.0 }
 0x2b5   :  { %v1380_v52 = vpop.f32.mrf.mxu0 }
 0x2b6   :  { %v502_v54 = vmax.f32 %v494_v49, 0.0  ;;  %v512_v1 = vadd.f32 %v504_v0, %v1725_v40  ;;  %v499_v16 = vadd.f32 %v1380_v52, %v1767_v11  ;;  %v1524_v11 = vld [vmem:[#allocation5 + $0x160] ss:$8 sps:$4 sm:$0xff]   ;;  %v1538_v0 = vld [vmem:[#allocation5 + $0x124] ss:$8 sps:$4 sm:$0xff]  }
 0x2b7   :  { %v478_v55 = vpop.f32.mrf.mxu0 }
 0x2b8   :  { %v510_v60 = vadd.f32 %v502_v54, %v1721_v31  ;;  %v497_v3 = vadd.f32 %v478_v55, %v1763_v7  ;;  %v518_v10 = vpack.c.bf16 %v512_v1, %v511_v6  ;;  %v507_v19 = vmax.f32 %v499_v16, 0.0  ;;  %v1544_v1 = vld [vmem:[#allocation5 + $0x104] ss:$8 sps:$4 sm:$0xff]  }
 0x2b9   :  { %v1381_v61 = vpop.f32.mrf.mxu0 }
 0x2ba   :  { %v517_v2 = vpack.c.bf16 %v510_v60, %v509_v59  ;;  %v505_v12 = vmax.f32 %v497_v3, 0.0  ;;  %v500_v14 = vadd.f32 %v1381_v61, %v1769_v13  ;;  %v515_v22 = vadd.f32 %v507_v19, %v1739_v57  ;;  %v1521_v13 = vld [vmem:[#allocation5 + $0x170] ss:$8 sps:$4 sm:$0xff]  }
 0x2bb   :  { %v481_v63 = vpop.f32.mrf.mxu0 }
 0x2bc   :  { %651 = vmatmul.mubr.bf16.vlgmr.msra.gmra.mxu0 %v517_v2  ;;  %v498_v5 = vadd.f32 %v481_v63, %v1765_v9  ;;  %v513_v17 = vadd.f32 %v505_v12, %v1732_v50  ;;  %v508_v18 = vmax.f32 %v500_v14, 0.0  ;;  %v1536_v2 = vld [vmem:[#allocation5 + $0x120] ss:$8 sps:$4 sm:$0xff]   ;;  %v1541_v63 = vld [vmem:[#allocation5 + $0x114] ss:$8 sps:$4 sm:$0xff]  }
 0x2bd   :  { %660 = vmatprep.mubr.bf16.mxu0 %v1647_v25  ;;  %886 = vmatpush1.bf16.msra.mxu0 %v1521_v13 }
 0x2be   :  { %v506_v8 = vmax.f32 %v498_v5, 0.0  ;;  %v516_v7 = vadd.f32 %v508_v18, %v1741_v58  ;;  %887 = vmatprep.subr.bf16.mxu0 %v1526_v26  ;;  %v1542_v5 = vld [vmem:[#allocation5 + $0x100] ss:$8 sps:$4 sm:$0xff]  }
 0x2c0   :  { %v514_v15 = vadd.f32 %v506_v8, %v1734_v51  ;;  %v520_v23 = vpack.c.bf16 %v516_v7, %v515_v22 }
 0x2c1   :  { %888 = vmatpush1.bf16.msra.mxu0 %v1524_v11 }
 0x2c2   :  { %v519_v9 = vpack.c.bf16 %v514_v15, %v513_v17  ;;  %889 = vmatprep.subr.bf16.mxu0 %v1529_v28 }
 0x2c4   :  { %661 = vmatmul.mubr.bf16.gmra.mxu0 %v518_v10 }
 0x2c5   :  { %670 = vmatprep.mubr.bf16.mxu0 %v1647_v25  ;;  %890 = vmatpush1.bf16.msra.mxu0 %v1527_v29 }
 0x2c6   :  { %891 = vmatprep.subr.bf16.mxu0 %v1532_v32 }
 0x2c9   :  { %892 = vmatpush1.bf16.msra.mxu0 %v1530_v33 }
 0x2ca   :  { %893 = vmatprep.subr.bf16.mxu0 %v1535_v34 }
 0x2cc   :  { %671 = vmatmul.mubr.bf16.gmra.mxu0 %v519_v9 }
 0x2cd   :  { %680 = vmatprep.mubr.bf16.mxu0 %v1647_v25  ;;  %894 = vmatpush1.bf16.msra.mxu0 %v1533_v35 }
 0x2ce   :  { %895 = vmatprep.subr.bf16.mxu0 %v1538_v0 }
 0x2d1   :  { %896 = vmatpush1.bf16.msra.mxu0 %v1536_v2 }
 0x2d2   :  { %897 = vmatprep.subr.bf16.mxu0 %v1541_v63 }
 0x2d4   :  { %681 = vmatmul.mubr.bf16.gmra.mxu0 %v520_v23 }
 0x2d5   :  { %917 = vmatprep.mubr.bf16.mxu0 %v1647_v25  ;;  %898 = vmatpush1.bf16.msra.mxu0 %v1539_v4 }
 0x2d6   :  { %899 = vmatprep.subr.bf16.mxu0 %v1544_v1 }
 0x2d9   :  { %900 = vmatpush1.bf16.msra.mxu0 %v1542_v5 }
 0x37c   :  { %v652_v36 = vpop.f32.mrf.mxu0 }
 0x37e   :  { %v654_v37 = vpop.f32.mrf.mxu0 }
 0x380   :  { %v656_v38 = vpop.f32.mrf.mxu0 }
 0x382   :  { %v658_v39 = vpop.f32.mrf.mxu0 }
 0x383   :  { %v691_v61 = vpack.c.bf16 %v658_v39, %v654_v37 }
 0x384   :  { %v662_v41 = vpop.f32.mrf.mxu0 }
 0x386   :  { %v664_v42 = vpop.f32.mrf.mxu0 }
 0x388   :  { %v666_v44 = vpop.f32.mrf.mxu0 }
 0x38a   :  { %v668_v45 = vpop.f32.mrf.mxu0 }
 0x38b   :  { %v692_v60 = vpack.c.bf16 %v668_v45, %v664_v42 }
 0x38c   :  { %v672_v46 = vpop.f32.mrf.mxu0 }
 0x38e   :  { %v674_v47 = vpop.f32.mrf.mxu0 }
 0x390   :  { %v676_v48 = vpop.f32.mrf.mxu0 }
 0x392   :  { %v678_v49 = vpop.f32.mrf.mxu0 }
 0x393   :  { %v693_v59 = vpack.c.bf16 %v678_v49, %v674_v47  ;;  %v1546_v49 = vld [vmem:[#allocation7 + $0x30] sm:$0xff]  }
 0x394   :  { %v1813_v52 = vpop.f32.mrf.mxu0 }
 0x396   :  { %v684_v53 = vpop.f32.mrf.mxu0 }
 0x398   :  { %v686_v54 = vpop.f32.mrf.mxu0 }
 0x39a   :  { %v688_v55 = vpop.f32.mrf.mxu0 }
 0x39b   :  { %v694_v56 = vpack.c.bf16 %v688_v55, %v684_v53  ;;  %v1548_v53 = vld [vmem:[#allocation7 + $0x20] sm:$0xff]  }
 0x39d   :  { %1382 = vmatprep.subr.bf16.mxu1 %v694_v56 }
 0x39e   :  { %1383 = vmatpush3.bf16.msra.mxu1 %v694_v56 }
 0x39f   :  { %1384 = vmatprep.subr.bf16.mxu1 %v693_v59 }
 0x3a2   :  { %1385 = vmatpush3.bf16.msra.mxu1 %v693_v59 }
 0x3a3   :  { %1386 = vmatprep.subr.bf16.mxu1 %v692_v60 }
 0x3a6   :  { %1387 = vmatpush3.bf16.msra.mxu1 %v692_v60 }
 0x3a7   :  { %1388 = vmatprep.subr.bf16.mxu1 %v691_v61 }
 0x3aa   :  { %1389 = vmatpush3.bf16.msra.mxu1 %v691_v61 }
 0x3ad   :  { %1391 = vmatmul.mubr.msk.bf16.vlgmr.msra.gmra.mxu1 %vm415_vm3, %v1774_v20 }
 0x3ae   :  { %1394 = vmatprep.mubr.msk.bf16.mxu1 %vm415_vm3, %v1779_v21 }
 0x3b5   :  { %1395 = vmatmul.mubr.msk.bf16.gmra.mxu1 %vm415_vm3, %v1788_v27 }
 0x3b6   :  { %1406 = vmatprep.mubr.msk.bf16.mxu1 %vm415_vm3, %v1749_v62 }
 0x46d   :  { %v1392_v6 = vpop.f32.mrf.mxu1 }
 0x46e   :  { %v762_v9 = vadd.f32 %v1392_v6, %v662_v41 }
 0x46f   :  { %v729_v3 = vpop.f32.mrf.mxu1 }
 0x470   :  { %v760_v8 = vadd.f32 %v729_v3, %v652_v36  ;;  %v770_v26 = vmax.f32 %v762_v9, 0.0 }
 0x471   :  { %v1393_v10 = vpop.f32.mrf.mxu1 }
 0x472   :  { %v768_v14 = vmax.f32 %v760_v8, 0.0  ;;  %v763_v16 = vadd.f32 %v1393_v10, %v666_v44  ;;  %v778_v29 = vadd.f32 %v770_v26, %v1727_v43 }
 0x473   :  { %v732_v12 = vpop.f32.mrf.mxu1 }
 0x474   :  { %v761_v15 = vadd.f32 %v732_v12, %v656_v38  ;;  %v776_v19 = vadd.f32 %v768_v14, %v1719_v30  ;;  %v771_v23 = vmax.f32 %v763_v16, 0.0  ;;  %v1550_v16 = vld [vmem:[#allocation7 + $0x10] sm:$0xff]  }
 0x475   :  { %v1396_v62 = vpop.f32.mrf.mxu1 }
 0x476   :  { %v769_v17 = vmax.f32 %v761_v15, 0.0  ;;  %v779_v11 = vadd.f32 %v771_v23, %v1725_v40  ;;  %v766_v38 = vadd.f32 %v1396_v62, %v1813_v52  ;;  %v1547_v52 = vld [vmem:[#allocation7 + $0x28] sm:$0xff]   ;;  %v1549_v62 = vld [vmem:[#allocation7 + $0x18] sm:$0xff]  }
 0x477   :  { %v745_v18 = vpop.f32.mrf.mxu1 }
 0x478   :  { %v777_v7 = vadd.f32 %v769_v17, %v1721_v31  ;;  %v764_v32 = vadd.f32 %v745_v18, %v672_v46  ;;  %v785_v34 = vpack.c.bf16 %v779_v11, %v778_v29  ;;  %v774_v44 = vmax.f32 %v766_v38, 0.0 }
 0x479   :  { %v1397_v22 = vpop.f32.mrf.mxu1 }
 0x47a   :  { %v784_v13 = vpack.c.bf16 %v777_v7, %v776_v19  ;;  %v772_v35 = vmax.f32 %v764_v32, 0.0  ;;  %v767_v36 = vadd.f32 %v1397_v22, %v686_v54  ;;  %v782_v46 = vadd.f32 %v774_v44, %v1739_v57 }
 0x47b   :  { %v748_v24 = vpop.f32.mrf.mxu1 }
 0x47c   :  { %918 = vmatmul.mubr.bf16.vlgmr.msra.gmra.mxu0 %v784_v13  ;;  %v765_v28 = vadd.f32 %v748_v24, %v676_v48  ;;  %v780_v39 = vadd.f32 %v772_v35, %v1732_v50  ;;  %v775_v41 = vmax.f32 %v767_v36, 0.0  ;;  %v1545_v48 = vld [vmem:[#allocation7 + $0x38] sm:$0xff]  }
 0x47d   :  { %927 = vmatprep.mubr.bf16.mxu0 %v1647_v25  ;;  %1414 = vmatprep.subr.bf16.mxu0 %v1545_v48 }
 0x47e   :  { %v773_v33 = vmax.f32 %v765_v28, 0.0  ;;  %v783_v45 = vadd.f32 %v775_v41, %v1741_v58  ;;  %1415 = vmatpush3.bf16.msra.mxu0 %v1545_v48 }
 0x47f   :  { %1416 = vmatprep.subr.bf16.mxu0 %v1546_v49 }
 0x480   :  { %v781_v37 = vadd.f32 %v773_v33, %v1734_v51  ;;  %v787_v47 = vpack.c.bf16 %v783_v45, %v782_v46 }
 0x482   :  { %v786_v42 = vpack.c.bf16 %v781_v37, %v780_v39  ;;  %1417 = vmatpush3.bf16.msra.mxu0 %v1546_v49 }
 0x483   :  { %1418 = vmatprep.subr.bf16.mxu0 %v1547_v52 }
 0x484   :  { %928 = vmatmul.mubr.bf16.gmra.mxu0 %v785_v34 }
 0x485   :  { %937 = vmatprep.mubr.bf16.mxu0 %v1647_v25 }
 0x486   :  { %1419 = vmatpush3.bf16.msra.mxu0 %v1547_v52 }
 0x487   :  { %1420 = vmatprep.subr.bf16.mxu0 %v1548_v53 }
 0x48a   :  { %1421 = vmatpush3.bf16.msra.mxu0 %v1548_v53 }
 0x48b   :  { %1422 = vmatprep.subr.bf16.mxu0 %v1549_v62 }
 0x48c   :  { %938 = vmatmul.mubr.bf16.gmra.mxu0 %v786_v42 }
 0x48d   :  { %947 = vmatprep.mubr.bf16.mxu0 %v1647_v25 }
 0x48e   :  { %1423 = vmatpush3.bf16.msra.mxu0 %v1549_v62 }
 0x48f   :  { %1424 = vmatprep.subr.bf16.mxu0 %v1550_v16 }
 0x492   :  { %1425 = vmatpush3.bf16.msra.mxu0 %v1550_v16 }
 0x494   :  { %948 = vmatmul.mubr.bf16.gmra.mxu0 %v787_v47 }
 0x53c   :  { %v919_v54 = vpop.f32.mrf.mxu0 }
 0x53e   :  { %v921_v25 = vpop.f32.mrf.mxu0 }
 0x540   :  { %v1835_v55 = vpop.f32.mrf.mxu0 }
 0x542   :  { %v925_v56 = vpop.f32.mrf.mxu0 }
 0x543   :  { %v958_v15 = vpack.c.bf16 %v925_v56, %v921_v25 }
 0x544   :  { %v929_v59 = vpop.f32.mrf.mxu0 }
 0x546   :  { %v931_v60 = vpop.f32.mrf.mxu0 }
 0x548   :  { %v933_v61 = vpop.f32.mrf.mxu0 }
 0x54a   :  { %v935_v0 = vpop.f32.mrf.mxu0 }
 0x54b   :  { %v959_v14 = vpack.c.bf16 %v935_v0, %v931_v60 }
 0x54c   :  { %v1837_v2 = vpop.f32.mrf.mxu0 }
 0x54e   :  { %v941_v63 = vpop.f32.mrf.mxu0 }
 0x550   :  { %v1839_v4 = vpop.f32.mrf.mxu0 }
 0x552   :  { %v945_v1 = vpop.f32.mrf.mxu0 }
 0x553   :  { %v960_v12 = vpack.c.bf16 %v945_v1, %v941_v63 }
 0x554   :  { %v1841_v5 = vpop.f32.mrf.mxu0 }
 0x556   :  { %v951_v6 = vpop.f32.mrf.mxu0 }
 0x558   :  { %v1843_v3 = vpop.f32.mrf.mxu0 }
 0x55a   :  { %v955_v8 = vpop.f32.mrf.mxu0 }
 0x55b   :  { %v961_v10 = vpack.c.bf16 %v955_v8, %v951_v6 }
 0x55d   :  { %1398 = vmatprep.subr.bf16.mxu1 %v961_v10 }
 0x55e   :  { %1399 = vmatpush3.bf16.msra.mxu1 %v961_v10 }
 0x55f   :  { %1400 = vmatprep.subr.bf16.mxu1 %v960_v12 }
 0x562   :  { %1401 = vmatpush3.bf16.msra.mxu1 %v960_v12 }
 0x563   :  { %1402 = vmatprep.subr.bf16.mxu1 %v959_v14 }
 0x566   :  { %1403 = vmatpush3.bf16.msra.mxu1 %v959_v14 }
 0x567   :  { %1404 = vmatprep.subr.bf16.mxu1 %v958_v15 }
 0x56a   :  { %1405 = vmatpush3.bf16.msra.mxu1 %v958_v15 }
 0x56b   :  { %1438 = vmatprep.subr.bf16.mxu1 %v1545_v48 }
 0x56d   :  { %1407 = vmatmul.mubr.msk.bf16.vlgmr.msra.gmra.mxu1 %vm415_vm3, %v1774_v20  ;;  %v1551_v20 = vld [vmem:[#allocation7 + $0x8] sm:$0xff]  }
 0x56e   :  { %1410 = vmatprep.mubr.msk.bf16.mxu1 %vm415_vm3, %v1779_v21  ;;  %1446 = vmatpush3.bf16.msra.mxu1 %v1545_v48  ;;  %v1552_v21 = vld [vmem:[#allocation7] sm:$0xff]  }
 0x56f   :  { %1439 = vmatprep.subr.bf16.mxu1 %v1546_v49  ;;  %1426 = vmatprep.subr.bf16.mxu0 %v1551_v20 }
 0x570   :  { %1427 = vmatpush3.bf16.msra.mxu0 %v1551_v20 }
 0x571   :  { %1428 = vmatprep.subr.bf16.mxu0 %v1552_v21 }
 0x572   :  { %1447 = vmatpush3.bf16.msra.mxu1 %v1546_v49 }
 0x573   :  { %1440 = vmatprep.subr.bf16.mxu1 %v1547_v52 }
 0x574   :  { %1429 = vmatpush3.bf16.msra.mxu0 %v1552_v21 }
 0x575   :  { %1411 = vmatmul.mubr.msk.bf16.gmra.mxu1 %vm415_vm3, %v1788_v27 }
 0x576   :  { %1448 = vmatpush3.bf16.msra.mxu1 %v1547_v52 }
 0x577   :  { %1441 = vmatprep.subr.bf16.mxu1 %v1548_v53 }
 0x57a   :  { %1449 = vmatpush3.bf16.msra.mxu1 %v1548_v53 }
 0x57b   :  { %1442 = vmatprep.subr.bf16.mxu1 %v1549_v62 }
 0x57e   :  { %1450 = vmatpush3.bf16.msra.mxu1 %v1549_v62 }
 0x57f   :  { %1443 = vmatprep.subr.bf16.mxu1 %v1550_v16 }
 0x582   :  { %1451 = vmatpush3.bf16.msra.mxu1 %v1550_v16 }
 0x583   :  { %1444 = vmatprep.subr.bf16.mxu1 %v1551_v20 }
 0x586   :  { %1452 = vmatpush3.bf16.msra.mxu1 %v1551_v20 }
 0x587   :  { %1445 = vmatprep.subr.bf16.mxu1 %v1552_v21 }
 0x58a   :  { %1453 = vmatpush3.bf16.msra.mxu1 %v1552_v21 }
 0x62d   :  { %v1408_v27 = vpop.f32.mrf.mxu1 }
 0x62e   :  { %v1029_v9 = vadd.f32 %v1408_v27, %v929_v59 }
 0x62f   :  { %v996_v17 = vpop.f32.mrf.mxu1 }
 0x630   :  { %v1027_v18 = vadd.f32 %v996_v17, %v919_v54  ;;  %v1037_v26 = vmax.f32 %v1029_v9, 0.0 }
 0x631   :  { %v1409_v19 = vpop.f32.mrf.mxu1 }
 0x632   :  { %v1030_v7 = vadd.f32 %v1409_v19, %v933_v61  ;;  %v1035_v23 = vmax.f32 %v1027_v18, 0.0  ;;  %v1045_v36 = vadd.f32 %v1037_v26, %v1727_v43 }
 0x633   :  { %v999_v22 = vpop.f32.mrf.mxu1 }
 0x634   :  { %v1038_v13 = vmax.f32 %v1030_v7, 0.0  ;;  %v1028_v24 = vadd.f32 %v999_v22, %v1835_v55  ;;  %v1043_v33 = vadd.f32 %v1035_v23, %v1719_v30 }
 0x635   :  { %v1412_v11 = vpop.f32.mrf.mxu1 }
 0x636   :  { %v1036_v28 = vmax.f32 %v1028_v24, 0.0  ;;  %v1046_v29 = vadd.f32 %v1038_v13, %v1725_v40  ;;  %v1033_v37 = vadd.f32 %v1412_v11, %v1841_v5 }
 0x637   :  { %v1012_v32 = vpop.f32.mrf.mxu1 }
 0x638   :  { %v1044_v34 = vadd.f32 %v1036_v28, %v1721_v31  ;;  %v1031_v35 = vadd.f32 %v1012_v32, %v1837_v2  ;;  %v1052_v42 = vpack.c.bf16 %v1046_v29, %v1045_v36  ;;  %v1041_v30 = vmax.f32 %v1033_v37, 0.0 }
 0x639   :  { %v1413_v38 = vpop.f32.mrf.mxu1 }
 0x63a   :  { %v1034_v39 = vadd.f32 %v1413_v38, %v1843_v3  ;;  %v1051_v41 = vpack.c.bf16 %v1044_v34, %v1043_v33  ;;  %v1039_v45 = vmax.f32 %v1031_v35, 0.0  ;;  %v1049_v49 = vadd.f32 %v1041_v30, %v1739_v57 }
 0x63b   :  { %v1015_v44 = vpop.f32.mrf.mxu1 }
 0x63c   :  { %v1042_v46 = vmax.f32 %v1034_v39, 0.0  ;;  %v1032_v40 = vadd.f32 %v1015_v44, %v1839_v4  ;;  %1430 = vmatprep.mubr.bf16.mxu0 %v1051_v41  ;;  %v1047_v43 = vadd.f32 %v1039_v45, %v1732_v50 }
 0x63d   :  { %1431 = vmatmul.mubr.bf16.vlgmr.msra.gmra.mxu0 %v1052_v42 }
 0x63e   :  { %v1040_v31 = vmax.f32 %v1032_v40, 0.0  ;;  %v1050_v47 = vadd.f32 %v1042_v46, %v1741_v58 }
 0x640   :  { %v1048_v48 = vadd.f32 %v1040_v31, %v1734_v51  ;;  %v1054_v53 = vpack.c.bf16 %v1050_v47, %v1049_v49 }
 0x642   :  { %v1053_v52 = vpack.c.bf16 %v1048_v48, %v1047_v43 }
 0x644   :  { %1434 = vmatprep.mubr.bf16.mxu1 %v1053_v52 }
 0x645   :  { %1435 = vmatmul.mubr.bf16.vlgmr.msra.gmra.mxu1 %v1054_v53 }
 0x6fd   :  { %v1432_v54 = vpop.f32.mrf.mxu0 }
 0x6fe   :  { %vm1186_vm4 = vcmp.ne.f32.partialorder %v1432_v54, %v1432_v54 }
 0x6ff   :  { %v1194_v25 = vsel %vm1186_vm4, 0.0, %v1432_v54  ;;  %v1153_v55 = vpop.f32.mrf.mxu0 }
 0x700   :  { %v1202_v56 = vadd.f32 %v1194_v25, %v1045_v36  ;;  %vm1184_vm5 = vcmp.ne.f32.partialorder %v1153_v55, %v1153_v55 }
 0x701   :  { %v1192_v59 = vsel %vm1184_vm5, 0.0, %v1153_v55  ;;  %v1433_v60 = vpop.f32.mrf.mxu0 }
 0x702   :  { %1210 = vst [vmem:[#allocation8 + $0x10] sm:$0xff] %v1202_v56  ;;  %v1200_v58 = vadd.f32 %v1192_v59, %v1043_v33  ;;  %vm1187_vm6 = vcmp.ne.f32.partialorder %v1433_v60, %v1433_v60 }
 0x703   :  { %v1195_v50 = vsel %vm1187_vm6, 0.0, %v1433_v60  ;;  %v1156_v61 = vpop.f32.mrf.mxu0 }
 0x704   :  { %1208 = vst [vmem:[#allocation8] sm:$0xff] %v1200_v58  ;;  %v1203_v51 = vadd.f32 %v1195_v50, %v1046_v29  ;;  %vm1185_vm7 = vcmp.ne.f32.partialorder %v1156_v61, %v1156_v61 }
 0x705   :  { %v1193_v57 = vsel %vm1185_vm7, 0.0, %v1156_v61  ;;  %v1436_v0 = vpop.f32.mrf.mxu1 }
 0x706   :  { %1211 = vst [vmem:[#allocation8 + $0x18] sm:$0xff] %v1203_v51  ;;  %v1201_v2 = vadd.f32 %v1193_v57, %v1044_v34  ;;  %vm1190_vm8 = vcmp.ne.f32.partialorder %v1436_v0, %v1436_v0 }
 0x707   :  { %v1198_v63 = vsel %vm1190_vm8, 0.0, %v1436_v0  ;;  %v1169_v4 = vpop.f32.mrf.mxu1 }
 0x708   :  { %1209 = vst [vmem:[#allocation8 + $0x8] sm:$0xff] %v1201_v2  ;;  %v1206_v1 = vadd.f32 %v1198_v63, %v1049_v49  ;;  %vm1188_vm9 = vcmp.ne.f32.partialorder %v1169_v4, %v1169_v4 }
 0x709   :  { %v1196_v5 = vsel %vm1188_vm9, 0.0, %v1169_v4  ;;  %v1437_v6 = vpop.f32.mrf.mxu1 }
 0x70a   :  { %1214 = vst [vmem:[#allocation8 + $0x30] sm:$0xff] %v1206_v1  ;;  %v1204_v3 = vadd.f32 %v1196_v5, %v1047_v43  ;;  %vm1191_vm10 = vcmp.ne.f32.partialorder %v1437_v6, %v1437_v6 }
 0x70b   :  { %v1199_v8 = vsel %vm1191_vm10, 0.0, %v1437_v6  ;;  %v1172_v10 = vpop.f32.mrf.mxu1 }
 0x70c   :  { %1212 = vst [vmem:[#allocation8 + $0x20] sm:$0xff] %v1204_v3  ;;  %v1207_v12 = vadd.f32 %v1199_v8, %v1050_v47  ;;  %vm1189_vm11 = vcmp.ne.f32.partialorder %v1172_v10, %v1172_v10 }
 0x70d   :  { %v1197_v14 = vsel %vm1189_vm11, 0.0, %v1172_v10 }
 0x70e   :  { %1215 = vst [vmem:[#allocation8 + $0x38] sm:$0xff] %v1207_v12  ;;  %v1205_v15 = vadd.f32 %v1197_v14, %v1048_v48 }
 0x710   :  { %1213 = vst [vmem:[#allocation8 + $0x28] sm:$0xff] %v1205_v15 }
 0x711   :  { %1624 = shalt.err (!%p1621_p5)
}
 0x712   :  { %1227 = dma.vmem_to_hbm [thread:$0]  %s1222_s7, 1024, %s1876_s6, [#allocation4], %s1641_s26, %s1641_s26, %s1642_s27  }
 0x713   :  { %1637 = dma.done.wait [#allocation4], 1024  }
 0x714   :  { %1638 = vsyncadd [#allocation4], 4294966272 }
 0x715   :  { %1231 = vsyncpa [#allocation3], 1 }
 0x716   :  { %1232 = vsyncpa [#allocation6], 1 }
 0x717   :  { %1233 = vsyncpa [#allocation4], 1 }

</bundles_post_ra>
